<compile_context>
chip_gen: v6e
topology: v6e:2x2x1
jax: 0.10.0
libtpu: 0.0.40
codegen_flags: <defaults>
</compile_context>

<pallas_src>
import functools
import math

import jax
import jax.numpy as jnp
from jax import lax
from jax.experimental import pallas as pl
from jax.experimental.pallas import tpu as pltpu


_VMEM_LIMIT = 40 * 1024 * 1024   # safe on v5e/v6e (128 MiB) and v7x (64 MiB)
_K1_BUDGET = 12 << 20
_K2_BUDGET = 6 << 20             # keep attention blocks small enough for v7x
_K3_BUDGET = 12 << 20


def _node_tile(n, bytes_per_node, budget, prefer_split=False):
    """Node-axis tile: N itself or a 128-multiple divisor fitting `budget`.

    prefer_split=True (used when batch == 1) picks a proper divisor when one
    exists so the grid has >= 2 parallel steps for v7x's two TensorCores.
    """
    cands = [n] + [t for t in range(128, n, 128) if n % t == 0]
    fit = [t for t in cands if t * bytes_per_node <= budget]
    pool = fit if fit else [min(cands)]
    if prefer_split:
        split = [t for t in pool if t < n]
        if split:
            pool = split
    return max(pool)


def _xavier_uniform(key, fan_in, fan_out):
    bound = math.sqrt(6.0 / (fan_in + fan_out))
    return jax.random.uniform(key, (fan_in, fan_out), jnp.float32, -bound, bound)


def _bn_scale_shift(partials, m):
    """Reduce per-tile [sum; sumsq] partials of shape (..., 2, C) to BN scale/shift."""
    sums = jnp.sum(partials, axis=tuple(range(partials.ndim - 2)))   # (2, C)
    mean = sums[0] / m
    var = jnp.maximum(sums[1] / m - mean * mean, 0.0)                # biased batch var
    inv = lax.rsqrt(var + 1e-5)                                      # gamma=1, beta=0
    return inv, -mean * inv


# ----------------------------------------------------------------------------
# Kernel 1: fused Q|K|V 1x1-conv projection (bf16 MXU) + partial BN statistics,
# stored node-last.
# ----------------------------------------------------------------------------
def _qkv_proj_kernel(x_ref, ste_ref, wx_ref, ws_ref, b_ref, yt_ref, st_ref):
    _, t, tn, din = x_ref.shape
    c3 = wx_ref.shape[1]
    x = x_ref[0].reshape(t * tn, din).astype(wx_ref.dtype)
    s = ste_ref[0].reshape(t * tn, din).astype(ws_ref.dtype)
    # concat([X, STE], -1) @ [Wq|Wk|Wv]  folded into two bf16 matmuls.
    h = (jnp.dot(x, wx_ref[...], preferred_element_type=jnp.float32)
         + jnp.dot(s, ws_ref[...], preferred_element_type=jnp.float32)
         + b_ref[...])                                        # (rows, 3D) f32
    # partial BatchNorm statistics for this tile
    st_ref[0, 0, 0:1, :] = jnp.sum(h, axis=0, keepdims=True)
    st_ref[0, 0, 1:2, :] = jnp.sum(h * h, axis=0, keepdims=True)
    # node-last store so the attention kernel is lane-dense over nodes
    yt_ref[...] = jnp.transpose(h.reshape(t, tn, c3), (0, 2, 1))[None]


# ----------------------------------------------------------------------------
# Kernel 2: per-group BN+ReLU, temporal attention (lane-parallel over nodes,
# accumulation loops -- no rank-4 temporaries), fused output projection.
# ----------------------------------------------------------------------------
def _attention_kernel(y_ref, sc_ref, sh_ref, wot_ref, bo_ref, z_ref, st_ref,
                      o_scr, *, num_groups, kw, use_mask):
    _, t, c3, tn = y_ref.shape
    dmodel = c3 // 3
    neg = jnp.float32(-2 ** 15 + 1)            # reference mask fill value

    if use_mask:
        kt = lax.broadcasted_iota(jnp.int32, (t, t), 0)      # key step
        qt = lax.broadcasted_iota(jnp.int32, (t, t), 1)      # query step
        keep = (qt >= kt)[:, :, None]                        # causal mask

    def _bn_relu(base, g):
        start = pl.multiple_of(base + g * kw, kw)
        raw = y_ref[0, :, pl.ds(start, kw), :]               # (T, kw, TN)
        sc = sc_ref[pl.ds(start, kw), :]                     # (kw, 1)
        sh = sh_ref[pl.ds(start, kw), :]
        return jnp.maximum(raw * sc + sh, 0.0)

    @pl.loop(0, num_groups)                    # bounds per-group live ranges
    def _group(g):
        q = _bn_relu(0, g)                     # (T, kw, TN); 1/sqrt(d) folded
        k = _bn_relu(dmodel, g)
        v = _bn_relu(2 * dmodel, g)
        # scores s[key, query, node] accumulated over the chunk width: only a
        # (T, T, TN) block stays live (no (T, T, kw, TN) broadcast temps).
        s = None
        for c in range(kw):
            term = k[:, c, :][:, None, :] * q[:, c, :][None, :, :]
            s = term if s is None else s + term
        if use_mask:
            s = jnp.where(keep, s, neg)
        m = jnp.max(s, axis=0)                               # (T, TN)
        p = jnp.exp(s - m[None, :, :])
        inv = 1.0 / jnp.sum(p, axis=0)                       # exact softmax
        p = p * inv[None, :, :]
        # o[c, query, node] accumulated over keys (small unrolled loop).
        o = None
        for tk in range(t):
            term = p[tk][None, :, :] * v[tk][:, None, :]     # (kw, T, TN)
            o = term if o is None else o + term
        o_scr[pl.ds(pl.multiple_of(g * kw, kw), kw), :, :] = o

    # fused output 1x1-conv: T small bf16 MXU matmuls whose free dimension is
    # the lane-dense node axis, plus partial BN statistics of z.
    wot = wot_ref[...]
    bo = bo_ref[...]
    zsum = jnp.zeros((dmodel, 1), jnp.float32)
    zsq = jnp.zeros((dmodel, 1), jnp.float32)
    for ti in range(t):
        ot = o_scr[:, ti, :].astype(wot.dtype)               # (D, TN)
        zt = jnp.dot(wot, ot, preferred_element_type=jnp.float32) + bo
        z_ref[0, ti, :, :] = zt
        zsum = zsum + jnp.sum(zt, axis=1, keepdims=True)
        zsq = zsq + jnp.sum(zt * zt, axis=1, keepdims=True)
    st_ref[0, 0, :, 0:1] = zsum
    st_ref[0, 0, :, 1:2] = zsq


# ----------------------------------------------------------------------------
# Kernel 3: final BatchNorm + ReLU, node-last (lane-dense) input, reference
# (B, T, N, D) output layout.
# ----------------------------------------------------------------------------
def _bn_relu_kernel(z_ref, sc_ref, sh_ref, o_ref):
    zn = jnp.maximum(z_ref[0] * sc_ref[...] + sh_ref[...], 0.0)   # (T, D, TN)
    o_ref[...] = jnp.transpose(zn, (0, 2, 1))[None]               # (1, T, TN, D)


# ----------------------------------------------------------------------------
# Module wrapper
# ----------------------------------------------------------------------------
class TemporalAttentionPallas:
    """Pallas-TPU forward pass of torch_geometric_temporal GMAN TemporalAttention."""

    def __init__(self, K: int, d: int, mask: bool, key):
        if mask and K != d:
            # The reference mask repeat (K*B) only broadcasts against the
            # attention batch (d*B) when K == d.
            raise ValueError("masked TemporalAttention requires K == d")
        self.K, self.d, self.mask = K, d, mask
        D = K * d
        kq, kk, kv, ko = jax.random.split(key, 4)
        # 1x1-conv weights (out,in,1,1) <-> (in,out) matmul weights; zero bias.
        wq = _xavier_uniform(kq, 2 * D, D)
        wk = _xavier_uniform(kk, 2 * D, D)
        wv = _xavier_uniform(kv, 2 * D, D)
        wqkv = jnp.concatenate([wq, wk, wv], axis=1)          # (2D, 3D)
        self.Wx = wqkv[:D].astype(jnp.bfloat16)               # applied to X
        self.Ws = wqkv[D:].astype(jnp.bfloat16)               # applied to STE
        self.bqkv = jnp.zeros((1, 3 * D), jnp.float32)
        wo = _xavier_uniform(ko, D, D)
        self.WoT = jnp.transpose(wo).astype(jnp.bfloat16)     # z = Wo^T @ o
        self.bo = jnp.zeros((D, 1), jnp.float32)

    def __call__(self, X, STE):
        B, T, N, D = X.shape
        K, d = self.K, self.d
        C3 = 3 * D
        M = B * T * N

        # ---------------- kernel 1: QKV projection + BN partials ----------
        bpn1 = 4 * T * (4 * D + 5 * C3)
        tn1 = _node_tile(N, bpn1, _K1_BUDGET, prefer_split=(B == 1))
        nt1 = N // tn1
        yt, stats_qkv = pl.pallas_call(
            _qkv_proj_kernel,
            grid=(B, nt1),
            in_specs=[
                pl.BlockSpec((1, T, tn1, D), lambda b, n: (b, 0, n, 0)),
                pl.BlockSpec((1, T, tn1, D), lambda b, n: (b, 0, n, 0)),
                pl.BlockSpec((D, C3), lambda b, n: (0, 0)),
                pl.BlockSpec((D, C3), lambda b, n: (0, 0)),
                pl.BlockSpec((1, C3), lambda b, n: (0, 0)),
            ],
            out_specs=[
                pl.BlockSpec((1, T, C3, tn1), lambda b, n: (b, 0, 0, n)),
                pl.BlockSpec((1, 1, 2, C3), lambda b, n: (b, n, 0, 0)),
            ],
            out_shape=[
                jax.ShapeDtypeStruct((B, T, C3, N), jnp.float32),
                jax.ShapeDtypeStruct((B, nt1, 2, C3), jnp.float32),
            ],
            compiler_params=pltpu.CompilerParams(
                dimension_semantics=("parallel", "parallel"),
                vmem_limit_bytes=_VMEM_LIMIT),
            cost_estimate=pl.CostEstimate(
                flops=4 * M * D * C3, transcendentals=0,
                bytes_accessed=4 * (2 * M * D + M * C3 + 2 * D * C3)),
        )(X, STE, self.Wx, self.Ws, self.bqkv)

        qkv_scale, qkv_shift = _bn_scale_shift(stats_qkv, M)      # (C3,), (C3,)
        # relu(x)*a == relu(x*a) for a > 0 and q only feeds the scores: fold
        # the reference 1/sqrt(d) scaling into q's BN scale/shift for free.
        sm = jnp.concatenate([jnp.full((D,), 1.0 / math.sqrt(d), jnp.float32),
                              jnp.ones((2 * D,), jnp.float32)])
        qkv_scale = (qkv_scale * sm).reshape(C3, 1)
        qkv_shift = (qkv_shift * sm).reshape(C3, 1)

        # ---------------- kernel 2: attention + output projection ---------
        bpn2 = 4 * (T * (2 * C3 + 3 * D) + 4 * T * T)
        tn2 = _node_tile(N, bpn2, _K2_BUDGET, prefer_split=(B == 1))
        nb = N // tn2
        kern = functools.partial(_attention_kernel,
                                 num_groups=d, kw=K, use_mask=self.mask)
        z, stats_out = pl.pallas_call(
            kern,
            grid=(B, nb),
            in_specs=[
                pl.BlockSpec((1, T, C3, tn2), lambda b, n: (b, 0, 0, n)),
                pl.BlockSpec((C3, 1), lambda b, n: (0, 0)),
                pl.BlockSpec((C3, 1), lambda b, n: (0, 0)),
                pl.BlockSpec((D, D), lambda b, n: (0, 0)),
                pl.BlockSpec((D, 1), lambda b, n: (0, 0)),
            ],
            out_specs=[
                pl.BlockSpec((1, T, D, tn2), lambda b, n: (b, 0, 0, n)),
                pl.BlockSpec((1, 1, D, 2), lambda b, n: (b, n, 0, 0)),
            ],
            out_shape=[
                jax.ShapeDtypeStruct((B, T, D, N), jnp.float32),
                jax.ShapeDtypeStruct((B, nb, D, 2), jnp.float32),
            ],
            scratch_shapes=[pltpu.VMEM((D, T, tn2), jnp.float32)],
            compiler_params=pltpu.CompilerParams(
                dimension_semantics=("parallel", "parallel"),
                vmem_limit_bytes=_VMEM_LIMIT),
            cost_estimate=pl.CostEstimate(
                flops=4 * d * K * B * N * T * T + 2 * M * D * D,
                transcendentals=d * B * N * T * T,
                bytes_accessed=4 * (M * C3 + 2 * M * D + D * D)),
        )(yt, qkv_scale, qkv_shift, self.WoT, self.bo)

        out_scale, out_shift = _bn_scale_shift(
            jnp.swapaxes(stats_out, -1, -2), M)
        out_scale = out_scale.reshape(D, 1)
        out_shift = out_shift.reshape(D, 1)

        # ---------------- kernel 3: final BatchNorm + ReLU ----------------
        bpn3 = 4 * T * 5 * D
        tn3 = _node_tile(N, bpn3, _K3_BUDGET, prefer_split=(B == 1))
        nt3 = N // tn3
        out = pl.pallas_call(
            _bn_relu_kernel,
            grid=(B, nt3),
            in_specs=[
                pl.BlockSpec((1, T, D, tn3), lambda b, n: (b, 0, 0, n)),
                pl.BlockSpec((D, 1), lambda b, n: (0, 0)),
                pl.BlockSpec((D, 1), lambda b, n: (0, 0)),
            ],
            out_specs=pl.BlockSpec((1, T, tn3, D), lambda b, n: (b, 0, n, 0)),
            out_shape=jax.ShapeDtypeStruct((B, T, N, D), jnp.float32),
            compiler_params=pltpu.CompilerParams(
                dimension_semantics=("parallel", "parallel"),
                vmem_limit_bytes=_VMEM_LIMIT),
        )(z, out_scale, out_shift)
        return out


if __name__ == "__main__":
    key = jax.random.PRNGKey(0)
    kx, kste, kp = jax.random.split(key, 3)

    B, T, N = 2, 8, 16          # batch, num_step (time), num_nodes
    K_heads, d_head = 4, 4      # K == d keeps the reference mask broadcast valid
    D = K_heads * d_head

    X = jax.random.normal(kx, (B, T, N, D), jnp.float32)
    STE = jax.random.normal(kste, (B, T, N, D), jnp.float32)

    module = TemporalAttentionPallas(K_heads, d_head, mask=True, key=kp)
    out = module(X, STE)
    jax.block_until_ready(out)
    assert out.shape == (B, T, N, D)
    assert out.dtype == jnp.float32
    assert bool(jnp.isfinite(out).all())
    print("KERNEL_OK")
</pallas_src>

<mosaic_0001>
module attributes {stable_mosaic.version = 11 : i64} {
  func.func @_qkv_proj_kernel(%arg0: i32, %arg1: i32, %arg2: memref<1x8x16x16xf32, #tpu.memory_space<vmem>>, %arg3: memref<1x8x16x16xf32, #tpu.memory_space<vmem>>, %arg4: memref<16x48xbf16, #tpu.memory_space<vmem>>, %arg5: memref<16x48xbf16, #tpu.memory_space<vmem>>, %arg6: memref<1x48xf32, #tpu.memory_space<vmem>>, %arg7: memref<1x8x48x16xf32, #tpu.memory_space<vmem>>, %arg8: memref<1x1x2x48xf32, #tpu.memory_space<vmem>>) attributes {dimension_semantics = [#tpu.dimension_semantics<parallel>, #tpu.dimension_semantics<parallel>], iteration_bounds = array<i64: 2, 1>, scalar_prefetch = 0 : i64, scratch_operands = 0 : i64, tpu.core_type = #tpu.core_type<tc>, window_params = [{transform_indices = @transform_0, window_bounds = array<i64: 1, 8, 16, 16>}, {transform_indices = @transform_1, window_bounds = array<i64: 1, 8, 16, 16>}, {pipeline_mode = #tpu.pipeline_mode<synchronous>, transform_indices = @transform_2, window_bounds = array<i64: 16, 48>}, {pipeline_mode = #tpu.pipeline_mode<synchronous>, transform_indices = @transform_3, window_bounds = array<i64: 16, 48>}, {pipeline_mode = #tpu.pipeline_mode<synchronous>, transform_indices = @transform_4, window_bounds = array<i64: 1, 48>}, {transform_indices = @transform_5, window_bounds = array<i64: 1, 8, 48, 16>}, {transform_indices = @transform_6, window_bounds = array<i64: 1, 1, 2, 48>}]} {
    %c0 = arith.constant 0 : index
    %c0_0 = arith.constant 0 : index
    %c0_1 = arith.constant 0 : index
    %c0_2 = arith.constant 0 : index
    %0 = vector.load %arg2[%c0, %c0_0, %c0_1, %c0_2] : memref<1x8x16x16xf32, #tpu.memory_space<vmem>>, vector<1x8x16x16xf32>
    %1 = vector.shape_cast %0 : vector<1x8x16x16xf32> to vector<8x16x16xf32>
    %2 = vector.shape_cast %1 : vector<8x16x16xf32> to vector<128x16xf32>
    %3 = arith.truncf %2 : vector<128x16xf32> to vector<128x16xbf16>
    %c0_3 = arith.constant 0 : index
    %c0_4 = arith.constant 0 : index
    %c0_5 = arith.constant 0 : index
    %c0_6 = arith.constant 0 : index
    %4 = vector.load %arg3[%c0_3, %c0_4, %c0_5, %c0_6] : memref<1x8x16x16xf32, #tpu.memory_space<vmem>>, vector<1x8x16x16xf32>
    %5 = vector.shape_cast %4 : vector<1x8x16x16xf32> to vector<8x16x16xf32>
    %6 = vector.shape_cast %5 : vector<8x16x16xf32> to vector<128x16xf32>
    %7 = arith.truncf %6 : vector<128x16xf32> to vector<128x16xbf16>
    %c0_7 = arith.constant 0 : index
    %c0_8 = arith.constant 0 : index
    %8 = vector.load %arg4[%c0_7, %c0_8] : memref<16x48xbf16, #tpu.memory_space<vmem>>, vector<16x48xbf16>
    %cst = arith.constant dense<0.000000e+00> : vector<128x48xf32>
    %9 = tpu.matmul %3, %8, %cst {dimension_numbers = #tpu.dot_dimension_numbers<[1], [0], [0], [1], [0, 0, 1, 1], [], []>} : vector<128x16xbf16>, vector<16x48xbf16>, vector<128x48xf32> -> vector<128x48xf32>
    %c0_9 = arith.constant 0 : index
    %c0_10 = arith.constant 0 : index
    %10 = vector.load %arg5[%c0_9, %c0_10] : memref<16x48xbf16, #tpu.memory_space<vmem>>, vector<16x48xbf16>
    %cst_11 = arith.constant dense<0.000000e+00> : vector<128x48xf32>
    %11 = tpu.matmul %7, %10, %cst_11 {dimension_numbers = #tpu.dot_dimension_numbers<[1], [0], [0], [1], [0, 0, 1, 1], [], []>} : vector<128x16xbf16>, vector<16x48xbf16>, vector<128x48xf32> -> vector<128x48xf32>
    %12 = arith.addf %9, %11 : vector<128x48xf32>
    %c0_12 = arith.constant 0 : index
    %c0_13 = arith.constant 0 : index
    %13 = vector.load %arg6[%c0_12, %c0_13] : memref<1x48xf32, #tpu.memory_space<vmem>>, vector<1x48xf32>
    %14 = vector.broadcast %13 : vector<1x48xf32> to vector<128x48xf32>
    %15 = arith.addf %12, %14 : vector<128x48xf32>
    %cst_14 = arith.constant dense<0.000000e+00> : vector<48xf32>
    %16 = vector.multi_reduction <add>, %15, %cst_14 [0] : vector<128x48xf32> to vector<48xf32>
    %17 = vector.shape_cast %16 : vector<48xf32> to vector<1x48xf32>
    %c0_15 = arith.constant 0 : index
    %c0_16 = arith.constant 0 : index
    %c0_17 = arith.constant 0 : index
    %c0_18 = arith.constant 0 : index
    %18 = vector.load %arg8[%c0_15, %c0_16, %c0_17, %c0_18] : memref<1x1x2x48xf32, #tpu.memory_space<vmem>>, vector<1x1x1x48xf32>
    %19 = vector.shape_cast %18 : vector<1x1x1x48xf32> to vector<1x48xf32>
    %20 = vector.shape_cast %17 : vector<1x48xf32> to vector<1x1x1x48xf32>
    tpu.vector_store %arg8[%c0_15, %c0_16, %c0_17, %c0_18], %20 {strides = array<i32>} : memref<1x1x2x48xf32, #tpu.memory_space<vmem>>, vector<1x1x1x48xf32>,
    %21 = arith.mulf %15, %15 : vector<128x48xf32>
    %cst_19 = arith.constant dense<0.000000e+00> : vector<48xf32>
    %22 = vector.multi_reduction <add>, %21, %cst_19 [0] : vector<128x48xf32> to vector<48xf32>
    %23 = vector.shape_cast %22 : vector<48xf32> to vector<1x48xf32>
    %c0_20 = arith.constant 0 : index
    %c0_21 = arith.constant 0 : index
    %c1 = arith.constant 1 : index
    %c0_22 = arith.constant 0 : index
    %24 = vector.load %arg8[%c0_20, %c0_21, %c1, %c0_22] : memref<1x1x2x48xf32, #tpu.memory_space<vmem>>, vector<1x1x1x48xf32>
    %25 = vector.shape_cast %24 : vector<1x1x1x48xf32> to vector<1x48xf32>
    %26 = vector.shape_cast %23 : vector<1x48xf32> to vector<1x1x1x48xf32>
    tpu.vector_store %arg8[%c0_20, %c0_21, %c1, %c0_22], %26 {strides = array<i32>} : memref<1x1x2x48xf32, #tpu.memory_space<vmem>>, vector<1x1x1x48xf32>,
    %27 = vector.shape_cast %15 : vector<128x48xf32> to vector<8x16x48xf32>
    %28 = tpu.transpose %27, [0, 2, 1] : vector<8x16x48xf32> -> vector<8x48x16xf32>
    %29 = vector.shape_cast %28 : vector<8x48x16xf32> to vector<1x8x48x16xf32>
    %c0_23 = arith.constant 0 : index
    %c0_24 = arith.constant 0 : index
    %c0_25 = arith.constant 0 : index
    %c0_26 = arith.constant 0 : index
    %30 = vector.load %arg7[%c0_23, %c0_24, %c0_25, %c0_26] : memref<1x8x48x16xf32, #tpu.memory_space<vmem>>, vector<1x8x48x16xf32>
    tpu.vector_store %arg7[%c0_23, %c0_24, %c0_25, %c0_26], %29 {strides = array<i32>} : memref<1x8x48x16xf32, #tpu.memory_space<vmem>>, vector<1x8x48x16xf32>,
    return
  }
  func.func @transform_0(%arg0: i32, %arg1: i32) -> (i32, i32, i32, i32) {
    %c0_i32 = arith.constant 0 : i32
    %c0_i32_0 = arith.constant 0 : i32
    %c0_i32_1 = arith.constant 0 : i32
    return %arg0, %c0_i32, %arg1, %c0_i32_0 : i32, i32, i32, i32
  }
  func.func @transform_1(%arg0: i32, %arg1: i32) -> (i32, i32, i32, i32) {
    %c0_i32 = arith.constant 0 : i32
    %c0_i32_0 = arith.constant 0 : i32
    %c0_i32_1 = arith.constant 0 : i32
    return %arg0, %c0_i32, %arg1, %c0_i32_0 : i32, i32, i32, i32
  }
  func.func @transform_2(%arg0: i32, %arg1: i32) -> (i32, i32) {
    %c0_i32 = arith.constant 0 : i32
    %c0_i32_0 = arith.constant 0 : i32
    %c0_i32_1 = arith.constant 0 : i32
    return %c0_i32, %c0_i32_0 : i32, i32
  }
  func.func @transform_3(%arg0: i32, %arg1: i32) -> (i32, i32) {
    %c0_i32 = arith.constant 0 : i32
    %c0_i32_0 = arith.constant 0 : i32
    %c0_i32_1 = arith.constant 0 : i32
    return %c0_i32, %c0_i32_0 : i32, i32
  }
  func.func @transform_4(%arg0: i32, %arg1: i32) -> (i32, i32) {
    %c0_i32 = arith.constant 0 : i32
    %c0_i32_0 = arith.constant 0 : i32
    %c0_i32_1 = arith.constant 0 : i32
    return %c0_i32, %c0_i32_0 : i32, i32
  }
  func.func @transform_5(%arg0: i32, %arg1: i32) -> (i32, i32, i32, i32) {
    %c0_i32 = arith.constant 0 : i32
    %c0_i32_0 = arith.constant 0 : i32
    %c0_i32_1 = arith.constant 0 : i32
    return %arg0, %c0_i32, %c0_i32_0, %arg1 : i32, i32, i32, i32
  }
  func.func @transform_6(%arg0: i32, %arg1: i32) -> (i32, i32, i32, i32) {
    %c0_i32 = arith.constant 0 : i32
    %c0_i32_0 = arith.constant 0 : i32
    %c0_i32_1 = arith.constant 0 : i32
    return %arg0, %arg1, %c0_i32, %c0_i32_0 : i32, i32, i32, i32
  }
}

</mosaic_0001>

<bundles_post_ra>
// kernel: tpu_custom_call.1
= control target key start
LH: loop header
LB: loop body
LE: loop exit
PB: predicated region body
PF: predicated region fallthrough
CT: control target
= control target key end

     0   :  { %s2192_s0 = inlined_call_operand.hbm [shape: f32[2,8,16,16], index: 0, kind: input, shape index: {}]   ;;  %s2193_s1 = inlined_call_operand.hbm [shape: f32[2,8,16,16], index: 1, kind: input, shape index: {}]   ;;  %s2194_s2 = inlined_call_operand.hbm [shape: bf16[16,48], index: 2, kind: input, shape index: {}]   ;;  %s2195_s3 = inlined_call_operand.hbm [shape: bf16[16,48], index: 3, kind: input, shape index: {}]   ;;  %s2196_s4 = inlined_call_operand.vmem [shape: f32[1,48], index: 4, kind: input, shape index: {}]   ;;  %s2197_s5 = inlined_call_operand.vmem [shape: f32[2,8,48,16], index: 5, kind: output, shape index: {0}]   ;;  %s2198_s6 = inlined_call_operand.hbm [shape: f32[2,1,2,48], index: 6, kind: output, shape index: {1}]  }
   0x1   :  { %2204 = sst [smem:[#allocation20_spill]] %s2192_s0 }
   0x2   :  { %2205 = sst [smem:[#allocation21_spill]] %s2194_s2 }
   0x3   :  { %2206 = sst [smem:[#allocation22_spill]] %s2195_s3 }
   0x4   :  { %12 = vsyncpa [#allocation3], 0 }
   0x5   :  { %14 = vsyncpa [#allocation3 + $0x1], 0 }
   0x6   :  { %15 = vsyncpa [#allocation6], 0 }
   0x7   :  { %17 = vsyncpa [#allocation6 + $0x1], 0 }
   0x8   :  { %18 = vsyncpa [#allocation9], 0 }
   0x9   :  { %19 = vsyncpa [#allocation4], 0 }
   0xa   :  { %21 = vsyncpa [#allocation4 + $0x1], 0  ;;  %s1742_s21 = smov 0   ;;  %s1744_s22 = smov 0  }
   0xb   :  { %s1746_s23 = smov 0   ;;  %s1748_s24 = smov 0  }
   0xc   :  { %s1750_s25 = smov 0   ;;  %s1752_s26 = smov 0  }
   0xd LB: > { %2207 = sst [smem:[#allocation16_spill]] %s1684_s23  ;;  %s1773_s27 = sadd.s32 4294967295, %s1696_s26   ;;  %s1696_s26 = sphi %s1752_s26, %s27_s26   ;;  %s1692_s25 = sphi %s1750_s25, %s2235_s25   ;;  %s1688_s24 = sphi %s1748_s24, %s2234_s24   ;;  %s1684_s23 = sphi %s1746_s23, %s2230_s23   ;;  %s1680_s22 = sphi %s1744_s22, %s2233_s22   ;;  %s1676_s21 = sphi %s1742_s21, %s2232_s21  }
   0xe   : > { %s1303_s28 = sadd.s32 4294967294, %s1696_s26   ;;  %p61_p0 = scmp.ne.s32.totalorder %s1680_s22, %s1676_s21 }
   0xf   : > { %p2199_p1 = scmp.eq.s32.totalorder %s1773_s27, 0  ;;  %p212_p3 = scmp.eq.s32.totalorder %s1303_s28, 1 }
  0x10   : > { %p1304_p5 = scmp.ge.s32.totalorder %s1696_s26, 1  ;;  %p219_p7 = scmp.lt.s32.totalorder %s1696_s26, 3 }
  0x11   : > { %p1782_p4 = por %p2199_p1, %p61_p0  ;;  %p1787_p6 = por %p212_p3, %p61_p0 }
  0x12   : > { %p1792_p8 = pnand %p1304_p5, %p219_p7  ;;  %s1698_s8 = smov [#allocation7]  }
  0x13   : > { %s2209_s30 = scalar_select %p1787_p6, 1, 0 }
  0x14   : > { %s231_s9 = sshll.u32 %s1698_s8, 4  ;;  %p1415_p9 = pneg %p1792_p8  ;;  %s232_s9 = int_to_ptr.vmem [resolvable:$true] %s231_s9 }
  0x15   : > { %2210 = sst [smem:[#allocation17_spill]] %s2209_s30  ;;  %s1699_s11 = smov [#allocation8]  }
  0x16   : > { %p1801_p11 = pnand %p1415_p9, %p2199_p1  ;;  %s244_s12 = sshll.u32 %s1699_s11, 4  ;;  %s245_s12 = int_to_ptr.vmem [resolvable:$true] %s244_s12 }
  0x17   : > { %s1507_s13 = scalar_lea.vmem %s232_s9, 128  ;;  %p1515_p5 = scmp.lt.s32.totalorder %s232_s9, %s232_s9 }
  0x18   : > { %p1498_p12 = pneg %p1801_p11  ;;  %p1508_p13 = scmp.ne.s32.totalorder %s232_s9, %s1507_s13 }
  0x19   : > { %p1516_p7 = scmp.lt.s32.totalorder %s1507_s13, %s1507_s13 }
  0x1a   : > { %p1510_p0 = pnand %p1508_p13, %p1498_p12 }
  0x1b   : > { %p1517_p10 = por %p1516_p7, %p1515_p5 }
  0x1c   : > { %p1511_p3 = pneg %p1510_p0 }
  0x1e   : > { %p1518_p9 = pnand %p1517_p10, %p1511_p3 }
  0x20   : > { %1521 = shalt.err (!%p1518_p9)
}
  0x21   : > { %s1700_s14 = smov 64   ;;  %s1701_s15 = smov 4  }
  0x22   : > { %s2213_s2 = sld [smem:[#allocation21_spill]]  ;;  %s1533_s18 = scalar_lea.vmem %s245_s12, 128 }
  0x23   : > { %p1534_p1 = scmp.ne.s32.totalorder %s245_s12, %s1533_s18  ;;  %p1541_p2 = scmp.lt.s32.totalorder %s245_s12, %s245_s12 }
  0x24   : > { %p1542_p6 = scmp.lt.s32.totalorder %s1533_s18, %s1533_s18 }
  0x25   : > { %p1536_p13 = pnand %p1534_p1, %p1498_p12 }
  0x26   : > { %p1543_p5 = por %p1542_p6, %p1541_p2 }
  0x27   : > { %p1537_p0 = pneg %p1536_p13 }
  0x28   : > { %1418 = dma.hbm_to_vmem [thread:$0]  (!%p1801_p11), %s2213_s2, 128, %s232_s9, [#allocation6], %s1700_s14, %s1700_s14, %s1701_s15  }
  0x29   : > { %p1544_p10 = pnand %p1543_p5, %p1537_p0 }
  0x2b   : > { %1547 = shalt.err (!%p1544_p10)
}
  0x2c   : > { %s2214_s3 = sld [smem:[#allocation22_spill]]  ;;  %s39_s28 = sadd.s32 1, %s1692_s25 }
  0x2d   : > { %s48_s8 = sadd.s32 1, %s1684_s23  ;;  %p41_p1 = scmp.ge.s32.totalorder %s39_s28, 2 }
  0x2e   : > { %p55_p2 = scmp.ne.s32.totalorder %s1684_s23, %s1680_s22  ;;  %p56_p6 = scmp.eq.s32.totalorder %s1696_s26, 0 }
  0x2f   : > { %p1435_p12 = scmp.lt.s32.totalorder %s1696_s26, 2  ;;  %s2237_s28 = smov (%p41_p1, %s39_s28), 0 }
  0x30   : > { %2215 = sst [smem:[#allocation18_spill]] %s2237_s28  ;;  %p57_p3 = por %p56_p6, %p55_p2 }
  0x31   : > { %p2216_p7 = scmp.eq.s32.totalorder %s1773_s27, 1  ;;  %s43_s10 = ssub.s32 %s1692_s25, %s2237_s28 }
  0x32   : > { %1421 = dma.hbm_to_vmem [thread:$0]  (!%p1801_p11), %s2214_s3, 128, %s245_s12, [#allocation9], %s1700_s14, %s1700_s14, %s1701_s15  }
  0x33   : > { %p1833_p9 = por %p2216_p7, %p55_p2  ;;  %s261_s11 = sand.u32 1, %s1684_s23  }
  0x34   : > { %p46_p11 = scmp.eq.s32.totalorder %s43_s10, 0  ;;  %s1840_s12 = sshll.u32 %s261_s11, 7 }
  0x35   : > { %s2200_s13 = sshll.u32 %s1692_s25, 11  ;;  %s2219_s0 = sld [smem:[#allocation20_spill]] }
  0x36   : > { %s1844_s14 = scalar_select %p46_p11, %s1684_s23, %s48_s8  }
  0x37   : > { %s265_s18 = scalar_lea.vmem [#allocation2], %s1840_s12  ;;  %p1854_p13 = pnand %p1435_p12, %p57_p3 }
  0x38   : > { %2218 = sst [smem:[#allocation19_spill]] %s1844_s14  ;;  %s274_s19 = sshll.u32 %s265_s18, 4  ;;  %s275_s19 = int_to_ptr.vmem [resolvable:$true] %s274_s19 }
  0x39   : > { %s262_s10 = scalar_lea.sflag [#allocation3], %s261_s11  ;;  %p1550_p0 = pneg %p1854_p13 }
  0x3a   : > { %s1561_s8 = scalar_lea.vmem %s275_s19, 2048  ;;  %s1702_s15 = smov [#allocation2]  }
  0x3b   : > { %s273_s17 = scalar_lea.hbm %s2219_s0, %s2200_s13  ;;  %p1562_p5 = scmp.ne.s32.totalorder %s275_s19, %s1561_s8 }
  0x3c   : > { %s1566_s16 = sshll.u32 %s1702_s15, 4  ;;  %s1567_s16 = int_to_ptr.vmem [resolvable:$false] %s1566_s16 }
  0x3d   : > { %p1564_p10 = pnand %p1562_p5, %p1550_p0  ;;  %s1568_s18 = scalar_lea.vmem %s1567_s16, 4096 }
  0x3e   : > { %p1569_p2 = scmp.lt.s32.totalorder %s275_s19, %s1567_s16  ;;  %p1570_p6 = scmp.lt.s32.totalorder %s1568_s18, %s1561_s8 }
  0x3f   : > { %p1565_p1 = pneg %p1564_p10 }
  0x40   : > { %p1571_p12 = por %p1570_p6, %p1569_p2 }
  0x42   : > { %p1572_p3 = pnand %p1571_p12, %p1565_p1 }
  0x44   : > { %1575 = shalt.err (!%p1572_p3)
}
  0x45   : > { %s1703_s13 = smov 128   ;;  %s1704_s11 = smov 8  }
  0x46   : > { %1425 = dma.hbm_to_vmem [thread:$0]  (!%p1854_p13), %s273_s17, 2048, %s275_s19, %s262_s10, %s1703_s13, %s1703_s13, %s1704_s11  }
  0x47   : > { %s2221_s0 = sshll.u32 %s1692_s25, 11  ;;  %s288_s28 = scalar_lea.vmem [#allocation5], %s1840_s12 }
  0x48   : > { %s296_s15 = scalar_lea.hbm %s2193_s1, %s2221_s0  ;;  %s297_s16 = sshll.u32 %s288_s28, 4  ;;  %s298_s16 = int_to_ptr.vmem [resolvable:$true] %s297_s16 }
  0x49   : > { %s284_s8 = sand.u32 1, %s1696_s26   ;;  %s1589_s14 = scalar_lea.vmem %s298_s16, 2048 }
  0x4a   : > { %s285_s18 = scalar_lea.sflag [#allocation6], %s284_s8  ;;  %p1590_p7 = scmp.ne.s32.totalorder %s298_s16, %s1589_s14 }
  0x4b   : > { %s1705_s23 = smov [#allocation5]  }
  0x4c   : > { %p1592_p11 = pnand %p1590_p7, %p1550_p0  ;;  %s1594_s30 = sshll.u32 %s1705_s23, 4  ;;  %s1595_s30 = int_to_ptr.vmem [resolvable:$false] %s1594_s30 }
  0x4d   : > { %s1596_s17 = scalar_lea.vmem %s1595_s30, 4096  ;;  %p1597_p10 = scmp.lt.s32.totalorder %s298_s16, %s1595_s30 }
  0x4e   : > { %p1593_p5 = pneg %p1592_p11  ;;  %p1598_p1 = scmp.lt.s32.totalorder %s1596_s17, %s1589_s14 }
  0x50   : > { %p1599_p2 = por %p1598_p1, %p1597_p10 }
  0x52   : > { %p1600_p6 = pnand %p1599_p2, %p1593_p5 }
  0x54   : > { %1603 = shalt.err (!%p1600_p6)
}
  0x55   : > { %1428 = dma.hbm_to_vmem [thread:$0]  (!%p1854_p13), %s296_s15, 2048, %s298_s16, %s285_s18, %s1703_s13, %s1703_s13, %s1704_s11  }
  0x56   : > { %309 = sbr.rel (%p1792_p8) target bundleno = 524 (0x20c), region = 40  ;;  %s1880_s0 = sand.u32 (!%p1792_p8), 1, %s1680_s22  }
  0x57   : > { %s1315_s2 = sshll.u32 (!%p1792_p8), %s1880_s0, 7  ;;  %s312_s3 = scalar_lea.sflag (!%p1792_p8), [#allocation3], %s1880_s0 }
  0x58   : > { %s1884_s23 = scalar_lea.vmem (!%p1792_p8), [#allocation2], %s1315_s2 }
  0x5b   : > { %1655 = dma.done.wait (%p1782_p4), %s312_s3, 2048  }
  0x5c   : > { %1657 = vsyncadd (%p1782_p4), %s312_s3, 4294965248  ;;  %s320_s30 = sand.u32 1, %s1773_s27   ;;  %s1891_s28 = scalar_lea.vmem [#allocation5], %s1315_s2 }
  0x5d   : > { %s321_s7 = scalar_lea.sflag [#allocation6], %s320_s30 }
  0x5e   : > { %1659 = dma.done.wait (%p1782_p4), %s321_s7, 2048  }
  0x5f   : > { %1661 = vsyncadd (%p1782_p4), %s321_s7, 4294965248  ;;  %p2222_p8 = scmp.eq.s32.totalorder %s1773_s27, 0 }
  0x61   : > { %1663 = dma.done.wait (%p2222_p8), [#allocation6], 128   ;;  %p2223_p13 = pmov %p2222_p8 }
  0x62   : > { %p2224_p0 = pmov %p2222_p8 }
  0x63   : > { %1665 = vsyncadd (%p2223_p13), [#allocation6], 4294967168 }
  0x64   : > { %1667 = dma.done.wait (%p2224_p0), [#allocation9], 128   ;;  %p2225_p12 = pmov %p2224_p0 }
  0x65   : > { %v1494_v0 = vld [vmem:[#allocation8] sm:$0xff]   ;;  %v1495_v1 = vld [vmem:[#allocation7] sm:$0xff]   ;;  %vm443_vm0 = vcmask 130048   ;;  %v411_v7 = vld [vmem:[%s1891_s28 + $0x10] sm:$0xff]  ;;  %vm715_vm1 = vcmask 392192   ;;  %s1319_s12 = sshll.u32 %s1880_s0, 1 }
  0x66   : > { %1669 = vsyncadd (%p2225_p12), [#allocation9], 4294967168  ;;  %1364 = vmatprep.subr.bf16.mxu0 %v1494_v0  ;;  %v409_v2 = vld [vmem:[%s1891_s28] sm:$0xff]  ;;  %v410_v3 = vld [vmem:[%s1891_s28 + $0x8] sm:$0xff]  ;;  %1382 = vmatprep.subr.bf16.mxu1 %v1495_v1  ;;  %vm753_vm2 = vcmask 385024   ;;  %s373_s13 = scalar_lea.vmem [#allocation10], %s1319_s12 }
  0x67   : > { %v385_v4 = vld [vmem:[%s1884_s23] sm:$0xff]  ;;  %1365 = vmatpush3.bf16.msra.mxu0 %v1494_v0  ;;  %v425_v5 = vpack.c.bf16 %v410_v3, %v409_v2  ;;  %v386_v6 = vld [vmem:[%s1884_s23 + $0x8] sm:$0xff]  ;;  %v412_v8 = vld [vmem:[%s1891_s28 + $0x18] sm:$0xff]  ;;  %1383 = vmatpush3.bf16.msra.mxu1 %v1495_v1  ;;  %s1341_s14 = sshll.u32 %s1688_s24, 5  ;;  %s1139_s19 = sshll.u32 %s373_s13, 4  ;;  %s1140_s19 = int_to_ptr.vmem [resolvable:$true] %s1139_s19 }
  0x68   : > { %v401_v9 = vpack.c.bf16 %v386_v6, %v385_v4  ;;  %v426_v10 = vpack.c.bf16 %v412_v8, %v411_v7  ;;  %v387_v11 = vld [vmem:[%s1884_s23 + $0x10] sm:$0xff]  ;;  %v388_v12 = vld [vmem:[%s1884_s23 + $0x18] sm:$0xff]  ;;  %v413_v13 = vld [vmem:[%s1891_s28 + $0x20] sm:$0xff]  ;;  %s1137_s11 = scalar_lea.hbm %s2198_s6, %s1341_s14  ;;  %s1122_s15 = scalar_lea.sflag [#allocation4], %s1880_s0 }
  0x69   : > { %1366 = vmatprep.mubr.msk.bf16.mxu0 %vm443_vm0, %v425_v5  ;;  %v402_v14 = vpack.c.bf16 %v388_v12, %v387_v11  ;;  %v414_v15 = vld [vmem:[%s1891_s28 + $0x28] sm:$0xff]  ;;  %v389_v16 = vld [vmem:[%s1884_s23 + $0x20] sm:$0xff]  ;;  %v415_v20 = vld [vmem:[%s1891_s28 + $0x30] sm:$0xff]  ;;  %s1604_s16 = scalar_lea.vmem %s1140_s19, 32  ;;  %s1706_s8 = smov [#allocation10]  }
  0x6a   : > { %v390_v17 = vld [vmem:[%s1884_s23 + $0x28] sm:$0xff]  ;;  %1384 = vmatprep.mubr.msk.bf16.mxu1 %vm443_vm0, %v401_v9  ;;  %1367 = vmatmul.mubr.msk.bf16.vlgmr.msra.gmra.mxu0 %vm443_vm0, %v426_v10  ;;  %v427_v18 = vpack.c.bf16 %v414_v15, %v413_v13  ;;  %v416_v21 = vld [vmem:[%s1891_s28 + $0x38] sm:$0xff]  ;;  %v391_v22 = vld [vmem:[%s1884_s23 + $0x30] sm:$0xff]  ;;  %p1605_p4 = scmp.ne.s32.totalorder %s1140_s19, %s1604_s16  ;;  %s1608_s18 = sshll.u32 %s1706_s8, 4  ;;  %s1609_s18 = int_to_ptr.vmem [resolvable:$false] %s1608_s18 }
  0x6b   : > { %v403_v19 = vpack.c.bf16 %v390_v17, %v389_v16  ;;  %1385 = vmatmul.mubr.msk.bf16.vlgmr.msra.gmra.mxu1 %vm443_vm0, %v402_v14  ;;  %v392_v23 = vld [vmem:[%s1884_s23 + $0x38] sm:$0xff]  ;;  %v417_v24 = vld [vmem:[%s1891_s28 + $0x40] sm:$0xff]  ;;  %v418_v25 = vld [vmem:[%s1891_s28 + $0x48] sm:$0xff]  ;;  %v428_v28 = vpack.c.bf16 %v416_v21, %v415_v20  ;;  %s1610_s17 = scalar_lea.vmem %s1609_s18, 64  ;;  %p1611_p11 = scmp.lt.s32.totalorder %s1140_s19, %s1609_s18 }
  0x6c   : > { %1370 = vmatprep.mubr.msk.bf16.mxu0 %vm443_vm0, %v427_v18  ;;  %v393_v26 = vld [vmem:[%s1884_s23 + $0x40] sm:$0xff]  ;;  %v394_v27 = vld [vmem:[%s1884_s23 + $0x48] sm:$0xff]  ;;  %v404_v29 = vpack.c.bf16 %v392_v23, %v391_v22  ;;  %v429_v30 = vpack.c.bf16 %v418_v25, %v417_v24  ;;  %v419_v32 = vld [vmem:[%s1891_s28 + $0x50] sm:$0xff]  ;;  %p1606_p3 = pnand %p1605_p4, %p1833_p9  ;;  %p1612_p5 = scmp.lt.s32.totalorder %s1610_s17, %s1604_s16 }
  0x6d   : > { %1388 = vmatprep.mubr.msk.bf16.mxu1 %vm443_vm0, %v403_v19  ;;  %v405_v31 = vpack.c.bf16 %v394_v27, %v393_v26  ;;  %v420_v33 = vld [vmem:[%s1891_s28 + $0x58] sm:$0xff]  ;;  %v395_v34 = vld [vmem:[%s1884_s23 + $0x50] sm:$0xff]  ;;  %v421_v36 = vld [vmem:[%s1891_s28 + $0x60] sm:$0xff] }
  0x6e   : > { %v396_v35 = vld [vmem:[%s1884_s23 + $0x58] sm:$0xff]  ;;  %v422_v37 = vld [vmem:[%s1891_s28 + $0x68] sm:$0xff]  ;;  %v397_v38 = vld [vmem:[%s1884_s23 + $0x60] sm:$0xff]  ;;  %v430_v40 = vpack.c.bf16 %v420_v33, %v419_v32  ;;  %p1607_p7 = pneg %p1606_p3  ;;  %p1613_p10 = por %p1612_p5, %p1611_p11 }
  0x6f   : > { %v398_v39 = vld [vmem:[%s1884_s23 + $0x68] sm:$0xff]  ;;  %v406_v41 = vpack.c.bf16 %v396_v35, %v395_v34  ;;  %v431_v42 = vpack.c.bf16 %v422_v37, %v421_v36  ;;  %v423_v44 = vld [vmem:[%s1891_s28 + $0x70] sm:$0xff]  ;;  %v424_v45 = vld [vmem:[%s1891_s28 + $0x78] sm:$0xff] }
  0x70   : > { %v407_v43 = vpack.c.bf16 %v398_v39, %v397_v38  ;;  %v399_v46 = vld [vmem:[%s1884_s23 + $0x70] sm:$0xff]  ;;  %v400_v47 = vld [vmem:[%s1884_s23 + $0x78] sm:$0xff]  ;;  %v432_v48 = vpack.c.bf16 %v424_v45, %v423_v44  ;;  %v1956_v52 = vld [vmem:[%s2196_s4] ss:$0 sm:$0xff]  ;;  %p1614_p1 = pnand %p1613_p10, %p1607_p7 }
  0x71   : > { %v408_v49 = vpack.c.bf16 %v400_v47, %v399_v46 }
  0x72   : > { %1371 = vmatmul.mubr.msk.bf16.gmra.mxu0 %vm443_vm0, %v428_v28 }
  0x73   : > { %1389 = vmatmul.mubr.msk.bf16.gmra.mxu1 %vm443_vm0, %v404_v29  ;;  %1374 = vmatprep.mubr.msk.bf16.mxu0 %vm443_vm0, %v429_v30 }
  0x74   : > { %1392 = vmatprep.mubr.msk.bf16.mxu1 %vm443_vm0, %v405_v31 }
  0x7a   : > { %1375 = vmatmul.mubr.msk.bf16.gmra.mxu0 %vm443_vm0, %v430_v40 }
  0x7b   : > { %1393 = vmatmul.mubr.msk.bf16.gmra.mxu1 %vm443_vm0, %v406_v41  ;;  %1378 = vmatprep.mubr.msk.bf16.mxu0 %vm443_vm0, %v431_v42 }
  0x7c   : > { %1396 = vmatprep.mubr.msk.bf16.mxu1 %vm443_vm0, %v407_v43 }
  0x82   : > { %1379 = vmatmul.mubr.msk.bf16.gmra.mxu0 %vm443_vm0, %v432_v48 }
  0x83   : > { %1397 = vmatmul.mubr.msk.bf16.gmra.mxu1 %vm443_vm0, %v408_v49 }
 0x12a   : > { %v1368_v50 = vpop.f32.mrf.mxu0 }
 0x12b   : > { %v1386_v51 = vpop.f32.mrf.mxu1 }
 0x12c   : > { %v638_v53 = vadd.f32 %v1386_v51, %v1368_v50  ;;  %v502_v54 = vpop.f32.mrf.mxu0 }
 0x12d   : > { %v629_v55 = vpop.f32.mrf.mxu1 }
 0x12e   : > { %v701_v56 = vadd.f32 %v1956_v52, %v638_v53  ;;  %v630_v57 = vadd.f32 %v629_v55, %v502_v54  ;;  %v1369_v58 = vpop.f32.mrf.mxu0 }
 0x12f   : > { %v1387_v59 = vpop.f32.mrf.mxu1 }
 0x130   : > { %v699_v60 = vadd.f32 %v1956_v52, %v630_v57  ;;  %v641_v61 = vadd.f32 %v1387_v59, %v1369_v58  ;;  %841 = vxpose.xlu1.b32.start [1/2] (short) (narrow) %v701_v56, 48  ;;  %v505_v62 = vpop.f32.mrf.mxu0  ;;  %v757_v9 = vmul.f32 %v701_v56, %v701_v56  ;;  %v719_v16 = vsel %vm715_vm1, %v701_v56, 0.0 }
 0x131   : > { %v632_v63 = vpop.f32.mrf.mxu1 }
 0x132   : > { %v702_v0 = vadd.f32 %v1956_v52, %v641_v61  ;;  %809 = vxpose.xlu0.b32.start [1/2] (short) (narrow) %v699_v60, 48  ;;  %v1372_v1 = vpop.f32.mrf.mxu0  ;;  %v633_v2 = vadd.f32 %v632_v63, %v505_v62  ;;  %v755_v6 = vmul.f32 %v699_v60, %v699_v60  ;;  %v716_v12 = vsel %vm715_vm1, %v699_v60, 0.0 }
 0x133   : > { %v1390_v3 = vpop.f32.mrf.mxu1  ;;  %v774_v26 = vsel %vm715_vm1, %v757_v9, 0.0 }
 0x134   : > { %v654_v4 = vadd.f32 %v1390_v3, %v1372_v1  ;;  %842 = vxpose.xlu1.b32.end [2/2] (short) (narrow) %v702_v0, 48  ;;  %v518_v5 = vpop.f32.mrf.mxu0  ;;  %v700_v7 = vadd.f32 %v1956_v52, %v633_v2  ;;  %v771_v21 = vsel %vm715_vm1, %v755_v6, 0.0  ;;  %v758_v22 = vmul.f32 %v702_v0, %v702_v0 }
 0x135   : > { %v645_v8 = vpop.f32.mrf.mxu1  ;;  %v721_v27 = vsel %vm715_vm1, %v702_v0, 0.0 }
 0x136   : > { %v646_v10 = vadd.f32 %v645_v8, %v518_v5  ;;  %v1373_v11 = vpop.f32.mrf.mxu0  ;;  %v717_v13 = vsel %vm715_vm1, %v700_v7, 0.0  ;;  %v756_v14 = vmul.f32 %v700_v7, %v700_v7  ;;  %810 = vxpose.xlu0.b32.end [2/2] (short) (narrow) %v700_v7, 48  ;;  %v705_v18 = vadd.f32 %v1956_v52, %v654_v4 }
 0x137   : > { %v1391_v15 = vpop.f32.mrf.mxu1  ;;  %v718_v17 = vadd.f32 %v717_v13, %v716_v12  ;;  %v776_v40 = vsel %vm715_vm1, %v758_v22, 0.0 }
 0x138   : > { %v1967_v19 = vadd.f32 %v1956_v52, %v646_v10  ;;  %v521_v20 = vpop.f32.mrf.mxu0  ;;  %v772_v23 = vsel %vm715_vm1, %v756_v14, 0.0  ;;  %v657_v24 = vadd.f32 %v1391_v15, %v1373_v11  ;;  %v761_v37 = vmul.f32 %v705_v18, %v705_v18 }
 0x139   : > { %v648_v25 = vpop.f32.mrf.mxu1  ;;  %v720_v28 = vadd.f32 %v719_v16, %v718_v17  ;;  %v773_v29 = vadd.f32 %v772_v23, %v771_v21  ;;  %v727_v49 = vsel %vm715_vm1, %v705_v18, 0.0 }
 0x13a   : > { %v1376_v30 = vpop.f32.mrf.mxu0  ;;  %v723_v31 = vsel %vm715_vm1, %v1967_v19, 0.0  ;;  %v759_v32 = vmul.f32 %v1967_v19, %v1967_v19  ;;  %v1978_v33 = vadd.f32 %v1956_v52, %v657_v24  ;;  %v649_v34 = vadd.f32 %v648_v25, %v521_v20 }
 0x13b   : > { %v1394_v35 = vpop.f32.mrf.mxu1  ;;  %v775_v36 = vadd.f32 %v774_v26, %v773_v29  ;;  %v722_v38 = vadd.f32 %v721_v27, %v720_v28  ;;  %v782_v55 = vsel %vm715_vm1, %v761_v37, 0.0 }
 0x13c   : > { %v534_v39 = vpop.f32.mrf.mxu0  ;;  %v778_v41 = vsel %vm715_vm1, %v759_v32, 0.0  ;;  %v1983_v42 = vadd.f32 %v1956_v52, %v649_v34  ;;  %v670_v43 = vadd.f32 %v1394_v35, %v1376_v30  ;;  %v762_v50 = vmul.f32 %v1978_v33, %v1978_v33 }
 0x13d   : > { %v661_v44 = vpop.f32.mrf.mxu1  ;;  %v724_v45 = vadd.f32 %v723_v31, %v722_v38  ;;  %v777_v46 = vadd.f32 %v776_v40, %v775_v36  ;;  %v729_v57 = vsel %vm715_vm1, %v1978_v33, 0.0 }
 0x13e   : > { %v662_v47 = vadd.f32 %v661_v44, %v534_v39  ;;  %v1377_v48 = vpop.f32.mrf.mxu0  ;;  %v725_v51 = vsel %vm715_vm1, %v1983_v42, 0.0  ;;  %v760_v53 = vmul.f32 %v1983_v42, %v1983_v42  ;;  %v1997_v61 = vadd.f32 %v1956_v52, %v670_v43 }
 0x13f   : > { %v1395_v54 = vpop.f32.mrf.mxu1  ;;  %v779_v56 = vadd.f32 %v778_v41, %v777_v46  ;;  %v726_v58 = vadd.f32 %v725_v51, %v724_v45  ;;  %v784_v5 = vsel %vm715_vm1, %v762_v50, 0.0 }
 0x140   : > { %v537_v59 = vpop.f32.mrf.mxu0  ;;  %v780_v60 = vsel %vm715_vm1, %v760_v53, 0.0  ;;  %v2000_v62 = vadd.f32 %v1956_v52, %v662_v47  ;;  %v673_v63 = vadd.f32 %v1395_v54, %v1377_v48  ;;  %v765_v14 = vmul.f32 %v1997_v61, %v1997_v61 }
 0x141   : > { %v664_v0 = vpop.f32.mrf.mxu1  ;;  %v728_v1 = vadd.f32 %v727_v49, %v726_v58  ;;  %v781_v2 = vadd.f32 %v780_v60, %v779_v56  ;;  %v735_v25 = vsel %vm715_vm1, %v1997_v61, 0.0 }
 0x142   : > { %v665_v3 = vadd.f32 %v664_v0, %v537_v59  ;;  %v1380_v4 = vpop.f32.mrf.mxu0  ;;  %v731_v6 = vsel %vm715_vm1, %v2000_v62, 0.0  ;;  %v763_v7 = vmul.f32 %v2000_v62, %v2000_v62  ;;  %v2008_v8 = vadd.f32 %v1956_v52, %v673_v63 }
 0x143   : > { %v1398_v9 = vpop.f32.mrf.mxu1  ;;  %v783_v10 = vadd.f32 %v782_v55, %v781_v2  ;;  %v730_v11 = vadd.f32 %v729_v57, %v728_v1  ;;  %v790_v34 = vsel %vm715_vm1, %v765_v14, 0.0 }
 0x144   : > { %v2011_v12 = vadd.f32 %v1956_v52, %v665_v3  ;;  %v550_v13 = vpop.f32.mrf.mxu0  ;;  %v786_v15 = vsel %vm715_vm1, %v763_v7, 0.0  ;;  %v686_v16 = vadd.f32 %v1398_v9, %v1380_v4  ;;  %v766_v26 = vmul.f32 %v2008_v8, %v2008_v8 }
 0x145   : > { %905 = vxpose.xlu1.b32.start [1/2] (short) (narrow) %v705_v18, 48  ;;  %v677_v17 = vpop.f32.mrf.mxu1  ;;  %v732_v20 = vadd.f32 %v731_v6, %v730_v11  ;;  %v785_v21 = vadd.f32 %v784_v5, %v783_v10  ;;  %v737_v35 = vsel %vm715_vm1, %v2008_v8, 0.0 }
 0x146   : > { %v733_v22 = vsel %vm715_vm1, %v2011_v12, 0.0  ;;  %v764_v23 = vmul.f32 %v2011_v12, %v2011_v12  ;;  %v1381_v24 = vpop.f32.mrf.mxu0  ;;  %v678_v27 = vadd.f32 %v677_v17, %v550_v13  ;;  %v713_v36 = vadd.f32 %v1956_v52, %v686_v16 }
 0x147   : > { %v1399_v28 = vpop.f32.mrf.mxu1  ;;  %v787_v29 = vadd.f32 %v786_v15, %v785_v21  ;;  %v734_v18 = vadd.f32 %v733_v22, %v732_v20  ;;  %873 = vxpose.xlu0.b32.start [1/2] (short) (narrow) %v1967_v19, 48  ;;  %v792_v43 = vsel %vm715_vm1, %v766_v26, 0.0 }
 0x148   : > { %v788_v30 = vsel %vm715_vm1, %v764_v23, 0.0  ;;  %v689_v31 = vadd.f32 %v1399_v28, %v1381_v24  ;;  %v553_v32 = vpop.f32.mrf.mxu0  ;;  %v711_v37 = vadd.f32 %v1956_v52, %v678_v27  ;;  %v769_v48 = vmul.f32 %v713_v36, %v713_v36 }
 0x149   : > { %906 = vxpose.xlu1.b32.end [2/2] (short) (narrow) %v1978_v33, 48  ;;  %v680_v38 = vpop.f32.mrf.mxu1  ;;  %v736_v39 = vadd.f32 %v735_v25, %v734_v18  ;;  %v789_v40 = vadd.f32 %v788_v30, %v787_v29  ;;  %v743_v53 = vsel %vm715_vm1, %v713_v36, 0.0 }
 0x14a   : > { %v681_v41 = vadd.f32 %v680_v38, %v553_v32  ;;  %v739_v19 = vsel %vm715_vm1, %v711_v37, 0.0  ;;  %v767_v44 = vmul.f32 %v711_v37, %v711_v37  ;;  %v714_v45 = vadd.f32 %v1956_v52, %v689_v31 }
 0x14b   : > { %v791_v46 = vadd.f32 %v790_v34, %v789_v40  ;;  %v738_v47 = vadd.f32 %v737_v35, %v736_v39  ;;  %874 = vxpose.xlu0.b32.end [2/2] (short) (narrow) %v1983_v42, 48  ;;  %v798_v59 = vsel %vm715_vm1, %v769_v48, 0.0 }
 0x14c   : > { %v794_v49 = vsel %vm715_vm1, %v767_v44, 0.0  ;;  %v712_v33 = vadd.f32 %v1956_v52, %v681_v41  ;;  %v770_v54 = vmul.f32 %v714_v45, %v714_v45  ;;  %v745_v60 = vsel %vm715_vm1, %v714_v45, 0.0 }
 0x14d   : > { %v740_v50 = vadd.f32 %v739_v19, %v738_v47  ;;  %v793_v51 = vadd.f32 %v792_v43, %v791_v46 }
 0x14e   : > { %v741_v55 = vsel %vm715_vm1, %v712_v33, 0.0  ;;  %v768_v56 = vmul.f32 %v712_v33, %v712_v33  ;;  %v800_v52 = vsel %vm715_vm1, %v770_v54, 0.0 }
 0x14f   : > { %v795_v57 = vadd.f32 %v794_v49, %v793_v51  ;;  %v742_v58 = vadd.f32 %v741_v55, %v740_v50 }
 0x150   : > { %v796_v42 = vsel %vm715_vm1, %v768_v56, 0.0 }
 0x151   : > { %v744_v63 = vadd.f32 %v743_v53, %v742_v58  ;;  %v797_v0 = vadd.f32 %v796_v42, %v795_v57 }
 0x153   : > { %v746_v1 = vadd.f32 %v745_v60, %v744_v63  ;;  %v799_v2 = vadd.f32 %v798_v59, %v797_v0 }
 0x155   : > { %v747_v3 = vrot.slane %v746_v1, 4  ;;  %v801_v4 = vadd.f32 %v800_v52, %v799_v2 }
 0x157   : > { %v748_v5 = vadd.f32 %v747_v3, %v746_v1  ;;  %v802_v6 = vrot.slane %v801_v4, 4 }
 0x159   : > { %v749_v7 = vrot.slane %v748_v5, 2  ;;  %v803_v9 = vadd.f32 %v802_v6, %v801_v4 }
 0x15a   : > { %969 = vxpose.xlu1.b32.start [1/2] (short) (narrow) %v1997_v61, 48 }
 0x15b   : > { %v750_v10 = vadd.f32 %v749_v7, %v748_v5  ;;  %v804_v11 = vrot.slane %v803_v9, 2 }
 0x15c   : > { %937 = vxpose.xlu0.b32.start [1/2] (short) (narrow) %v2000_v62, 48 }
 0x15d   : > { %v751_v13 = vrot.slane %v750_v10, 1  ;;  %v805_v14 = vadd.f32 %v804_v11, %v803_v9 }
 0x15e   : > { %970 = vxpose.xlu1.b32.end [2/2] (short) (narrow) %v2008_v8, 48 }
 0x15f   : > { %v752_v15 = vadd.f32 %v751_v13, %v750_v10  ;;  %v806_v16 = vrot.slane %v805_v14, 1 }
 0x160   : > { %938 = vxpose.xlu0.b32.end [2/2] (short) (narrow) %v2011_v12, 48 }
 0x161   : > { %754 = vst.msk [vmem:[%s373_s13] sm:$0x1] %vm753_vm2, %v752_v15  ;;  %v807_v61 = vadd.f32 %v806_v16, %v805_v14 }
 0x163   : > { %808 = vst.msk [vmem:[%s373_s13 + $0x1] sm:$0x1] %vm753_vm2, %v807_v61 }
 0x16f   : > { %1033 = vxpose.xlu1.b32.start [1/2] (short) (narrow) %v713_v36, 48 }
 0x171   : > { %1001 = vxpose.xlu0.b32.start [1/2] (short) (narrow) %v711_v37, 48 }
 0x173   : > { %1034 = vxpose.xlu1.b32.end [2/2] (short) (narrow) %v714_v45, 48 }
 0x175   : > { %1002 = vxpose.xlu0.b32.end [2/2] (short) (narrow) %v712_v33, 48 }
 0x176   : > { %1617 = shalt.err (!%p1614_p1)
}
 0x177   : > { %s1618_s2 = scalar_lea.hbm %s1137_s11, 32  ;;  %s1622_s23 = scalar_lea.hbm %s2198_s6, 64 }
 0x178   : > { %p1619_p2 = scmp.ne.s32.totalorder %s1137_s11, %s1618_s2  ;;  %p1623_p13 = scmp.lt.s32.totalorder %s1137_s11, %s2198_s6 }
 0x179   : > { %p1624_p0 = scmp.lt.s32.totalorder %s1622_s23, %s1618_s2 }
 0x17a   : > { %p1620_p6 = pnand %p1619_p2, %p1833_p9 }
 0x17b   : > { %p1625_p12 = por %p1624_p0, %p1623_p13 }
 0x17c   : > { %p1621_p8 = pneg %p1620_p6 }
 0x17e   : > { %p1626_p4 = pnand %p1625_p12, %p1621_p8 }
 0x180   : > { %1629 = shalt.err (!%p1626_p4)
}
 0x181   : > { %1413 = dma.vmem_to_hbm [thread:$0]  (%p1833_p9), %s1140_s19, 32, %s1137_s11, %s1122_s15  }
 0x182   : > { %p376_p3 = scmp.lt.s32.totalorder %s1688_s24, 1 }
 0x184   : > { %s2239_s24 = smov (!%p376_p3, %s1688_s24), 1 }
 0x185   : > { %s1400_s28 = smul.u32 384, %s2239_s24 }
 0x187   : > { %s2071_s12 = scalar_lea.vmem %s2197_s5, %s1400_s28 }
 0x1ac   : > { %v857_v62 = vpop.trf.xlu1 }
 0x1ad   : > { %1071 = vst.msk [vmem:[%s2071_s12 + $0x30] sm:$0xff] %vm443_vm0, %v857_v62 }
 0x1ae   : > { %v825_v8 = vpop.trf.xlu0 }
 0x1af   : > { %1065 = vst.msk [vmem:[%s2071_s12] sm:$0xff] %vm443_vm0, %v825_v8 }
 0x1b0   : > { %v858_v12 = vpop.trf.xlu1 }
 0x1b1   : > { %1072 = vst.msk [vmem:[%s2071_s12 + $0x38] sm:$0xff] %vm443_vm0, %v858_v12 }
 0x1b2   : > { %v826_v17 = vpop.trf.xlu0 }
 0x1b3   : > { %1066 = vst.msk [vmem:[%s2071_s12 + $0x8] sm:$0xff] %vm443_vm0, %v826_v17 }
 0x1b4   : > { %v859_v20 = vpop.trf.xlu1 }
 0x1b5   : > { %1073 = vst.msk [vmem:[%s2071_s12 + $0x40] sm:$0xff] %vm443_vm0, %v859_v20 }
 0x1b6   : > { %v827_v21 = vpop.trf.xlu0 }
 0x1b7   : > { %1067 = vst.msk [vmem:[%s2071_s12 + $0x10] sm:$0xff] %vm443_vm0, %v827_v21 }
 0x1b8   : > { %v860_v22 = vpop.trf.xlu1 }
 0x1b9   : > { %1074 = vst.msk [vmem:[%s2071_s12 + $0x48] sm:$0xff] %vm443_vm0, %v860_v22 }
 0x1ba   : > { %v828_v23 = vpop.trf.xlu0 }
 0x1bb   : > { %1068 = vst.msk [vmem:[%s2071_s12 + $0x18] sm:$0xff] %vm443_vm0, %v828_v23 }
 0x1bc   : > { %v861_v24 = vpop.trf.xlu1 }
 0x1bd   : > { %1075 = vst.msk [vmem:[%s2071_s12 + $0x50] sm:$0xff] %vm443_vm0, %v861_v24 }
 0x1be   : > { %v829_v25 = vpop.trf.xlu0 }
 0x1bf   : > { %1069 = vst.msk [vmem:[%s2071_s12 + $0x20] sm:$0xff] %vm443_vm0, %v829_v25 }
 0x1c0   : > { %v862_v26 = vpop.trf.xlu1 }
 0x1c1   : > { %1076 = vst.msk [vmem:[%s2071_s12 + $0x58] sm:$0xff] %vm443_vm0, %v862_v26 }
 0x1c2   : > { %v830_v27 = vpop.trf.xlu0 }
 0x1c3   : > { %1070 = vst.msk [vmem:[%s2071_s12 + $0x28] sm:$0xff] %vm443_vm0, %v830_v27 }
 0x1c4   : > { %v921_v28 = vpop.trf.xlu1 }
 0x1c5   : > { %1083 = vst.msk [vmem:[%s2071_s12 + $0x90] sm:$0xff] %vm443_vm0, %v921_v28 }
 0x1c6   : > { %v889_v29 = vpop.trf.xlu0 }
 0x1c7   : > { %1077 = vst.msk [vmem:[%s2071_s12 + $0x60] sm:$0xff] %vm443_vm0, %v889_v29 }
 0x1c8   : > { %v922_v18 = vpop.trf.xlu1 }
 0x1c9   : > { %1084 = vst.msk [vmem:[%s2071_s12 + $0x98] sm:$0xff] %vm443_vm0, %v922_v18 }
 0x1ca   : > { %v890_v30 = vpop.trf.xlu0 }
 0x1cb   : > { %1078 = vst.msk [vmem:[%s2071_s12 + $0x68] sm:$0xff] %vm443_vm0, %v890_v30 }
 0x1cc   : > { %v923_v31 = vpop.trf.xlu1 }
 0x1cd   : > { %1085 = vst.msk [vmem:[%s2071_s12 + $0xa0] sm:$0xff] %vm443_vm0, %v923_v31 }
 0x1ce   : > { %v891_v32 = vpop.trf.xlu0 }
 0x1cf   : > { %1079 = vst.msk [vmem:[%s2071_s12 + $0x70] sm:$0xff] %vm443_vm0, %v891_v32 }
 0x1d0   : > { %v924_v34 = vpop.trf.xlu1 }
 0x1d1   : > { %1086 = vst.msk [vmem:[%s2071_s12 + $0xa8] sm:$0xff] %vm443_vm0, %v924_v34 }
 0x1d2   : > { %v892_v35 = vpop.trf.xlu0 }
 0x1d3   : > { %1080 = vst.msk [vmem:[%s2071_s12 + $0x78] sm:$0xff] %vm443_vm0, %v892_v35 }
 0x1d4   : > { %v925_v36 = vpop.trf.xlu1 }
 0x1d5   : > { %1087 = vst.msk [vmem:[%s2071_s12 + $0xb0] sm:$0xff] %vm443_vm0, %v925_v36 }
 0x1d6   : > { %v893_v37 = vpop.trf.xlu0 }
 0x1d7   : > { %1081 = vst.msk [vmem:[%s2071_s12 + $0x80] sm:$0xff] %vm443_vm0, %v893_v37 }
 0x1d8   : > { %v926_v38 = vpop.trf.xlu1 }
 0x1d9   : > { %1088 = vst.msk [vmem:[%s2071_s12 + $0xb8] sm:$0xff] %vm443_vm0, %v926_v38 }
 0x1da   : > { %v894_v39 = vpop.trf.xlu0 }
 0x1db   : > { %1082 = vst.msk [vmem:[%s2071_s12 + $0x88] sm:$0xff] %vm443_vm0, %v894_v39 }
 0x1dc   : > { %v985_v40 = vpop.trf.xlu1 }
 0x1dd   : > { %1095 = vst.msk [vmem:[%s2071_s12 + $0xf0] sm:$0xff] %vm443_vm0, %v985_v40 }
 0x1de   : > { %v953_v41 = vpop.trf.xlu0 }
 0x1df   : > { %1089 = vst.msk [vmem:[%s2071_s12 + $0xc0] sm:$0xff] %vm443_vm0, %v953_v41 }
 0x1e0   : > { %v986_v43 = vpop.trf.xlu1 }
 0x1e1   : > { %1096 = vst.msk [vmem:[%s2071_s12 + $0xf8] sm:$0xff] %vm443_vm0, %v986_v43 }
 0x1e2   : > { %v954_v19 = vpop.trf.xlu0 }
 0x1e3   : > { %1090 = vst.msk [vmem:[%s2071_s12 + $0xc8] sm:$0xff] %vm443_vm0, %v954_v19 }
 0x1e4   : > { %v987_v44 = vpop.trf.xlu1 }
 0x1e5   : > { %1097 = vst.msk [vmem:[%s2071_s12 + $0x100] sm:$0xff] %vm443_vm0, %v987_v44 }
 0x1e6   : > { %v955_v45 = vpop.trf.xlu0 }
 0x1e7   : > { %1091 = vst.msk [vmem:[%s2071_s12 + $0xd0] sm:$0xff] %vm443_vm0, %v955_v45 }
 0x1e8   : > { %v988_v46 = vpop.trf.xlu1 }
 0x1e9   : > { %1098 = vst.msk [vmem:[%s2071_s12 + $0x108] sm:$0xff] %vm443_vm0, %v988_v46 }
 0x1ea   : > { %v956_v47 = vpop.trf.xlu0 }
 0x1eb   : > { %1092 = vst.msk [vmem:[%s2071_s12 + $0xd8] sm:$0xff] %vm443_vm0, %v956_v47 }
 0x1ec   : > { %v989_v48 = vpop.trf.xlu1 }
 0x1ed   : > { %1099 = vst.msk [vmem:[%s2071_s12 + $0x110] sm:$0xff] %vm443_vm0, %v989_v48 }
 0x1ee   : > { %v957_v49 = vpop.trf.xlu0 }
 0x1ef   : > { %1093 = vst.msk [vmem:[%s2071_s12 + $0xe0] sm:$0xff] %vm443_vm0, %v957_v49 }
 0x1f0   : > { %v990_v33 = vpop.trf.xlu1 }
 0x1f1   : > { %1100 = vst.msk [vmem:[%s2071_s12 + $0x118] sm:$0xff] %vm443_vm0, %v990_v33 }
 0x1f2   : > { %v958_v50 = vpop.trf.xlu0 }
 0x1f3   : > { %1094 = vst.msk [vmem:[%s2071_s12 + $0xe8] sm:$0xff] %vm443_vm0, %v958_v50 }
 0x1f4   : > { %v1049_v51 = vpop.trf.xlu1 }
 0x1f5   : > { %1107 = vst.msk [vmem:[%s2071_s12 + $0x150] sm:$0xff] %vm443_vm0, %v1049_v51 }
 0x1f6   : > { %v1017_v53 = vpop.trf.xlu0 }
 0x1f7   : > { %1101 = vst.msk [vmem:[%s2071_s12 + $0x120] sm:$0xff] %vm443_vm0, %v1017_v53 }
 0x1f8   : > { %v1050_v54 = vpop.trf.xlu1 }
 0x1f9   : > { %1108 = vst.msk [vmem:[%s2071_s12 + $0x158] sm:$0xff] %vm443_vm0, %v1050_v54 }
 0x1fa   : > { %v1018_v55 = vpop.trf.xlu0 }
 0x1fb   : > { %1102 = vst.msk [vmem:[%s2071_s12 + $0x128] sm:$0xff] %vm443_vm0, %v1018_v55 }
 0x1fc   : > { %v1051_v56 = vpop.trf.xlu1 }
 0x1fd   : > { %1109 = vst.msk [vmem:[%s2071_s12 + $0x160] sm:$0xff] %vm443_vm0, %v1051_v56 }
 0x1fe   : > { %v1019_v57 = vpop.trf.xlu0 }
 0x1ff   : > { %1103 = vst.msk [vmem:[%s2071_s12 + $0x130] sm:$0xff] %vm443_vm0, %v1019_v57 }
 0x200   : > { %v1052_v58 = vpop.trf.xlu1 }
 0x201   : > { %1110 = vst.msk [vmem:[%s2071_s12 + $0x168] sm:$0xff] %vm443_vm0, %v1052_v58 }
 0x202   : > { %v1020_v59 = vpop.trf.xlu0 }
 0x203   : > { %1104 = vst.msk [vmem:[%s2071_s12 + $0x138] sm:$0xff] %vm443_vm0, %v1020_v59 }
 0x204   : > { %v1053_v60 = vpop.trf.xlu1 }
 0x205   : > { %1111 = vst.msk [vmem:[%s2071_s12 + $0x170] sm:$0xff] %vm443_vm0, %v1053_v60 }
 0x206   : > { %v1021_v42 = vpop.trf.xlu0 }
 0x207   : > { %1105 = vst.msk [vmem:[%s2071_s12 + $0x140] sm:$0xff] %vm443_vm0, %v1021_v42 }
 0x208   : > { %v1054_v63 = vpop.trf.xlu1 }
 0x209   : > { %1112 = vst.msk [vmem:[%s2071_s12 + $0x178] sm:$0xff] %vm443_vm0, %v1054_v63 }
 0x20a   : > { %v1022_v0 = vpop.trf.xlu0 }
 0x20b   : > { %1106 = vst.msk [vmem:[%s2071_s12 + $0x148] sm:$0xff] %vm443_vm0, %v1022_v0 }
 0x20c PF: > { %s2226_s24 = sld [smem:[#allocation17_spill]]  ;;  %s1162_s9 = sand.u32 1, %s1676_s21  }
 0x20d   : > { %p2228_p7 = scmp.ge.s32.totalorder %s1696_s26, 2  ;;  %s1163_s13 = scalar_lea.sflag [#allocation4], %s1162_s9 }
 0x212   : > { %p2227_p9 = scmp.ne.s32.totalorder %s2226_s24, 0 }
 0x214   : > { %p1430_p11 = pnand %p2228_p7, %p2227_p9 }
 0x216   : > { %p1431_p5 = pneg %p1430_p11 }
 0x218   : > { %1671 = dma.done.wait (%p1431_p5), %s1163_s13, 32  }
 0x219   : > { %1673 = vsyncadd (%p1431_p5), %s1163_s13, 4294967264  ;;  %s27_s26 = sadd.s32 1, %s1696_s26   ;;  %s2229_s14 = sld [smem:[#allocation16_spill]] }
 0x21a   : > { %p24_p10 = scmp.ge.s32.totalorder %s27_s26, 4   ;;  %s2230_s23 = sld [smem:[#allocation19_spill]] }
 0x21b   : > { %s2231_s19 = sld [smem:[#allocation18_spill]]  ;;  %s2232_s21 = smov %s1680_s22 }
 0x21c   : > { %s2234_s24 = smov %s1692_s25 }
 0x21d   :  { %26 = sbr.rel (!%p24_p10) target bundleno = 13 (0xd), region = 118 }
 0x21f   : > { %s2233_s22 = smov %s2229_s14 }
 0x221   : > { %s2235_s25 = smov %s2231_s19 }
 0x222   :  { %1168 = vsyncpa [#allocation3], 1 }
 0x223   :  { %1170 = vsyncpa [#allocation3 + $0x1], 1 }
 0x224   :  { %1171 = vsyncpa [#allocation6], 1 }
 0x225   :  { %1173 = vsyncpa [#allocation6 + $0x1], 1 }
 0x226   :  { %1174 = vsyncpa [#allocation9], 1 }
 0x227   :  { %1175 = vsyncpa [#allocation4], 1 }
 0x228   :  { %1177 = vsyncpa [#allocation4 + $0x1], 1 }

</bundles_post_ra>
